<compile_context>
chip_gen: v7x
topology: tpu7x:2x2x1
jax: 0.10.0
libtpu: 0.0.40
codegen_flags: <defaults>
</compile_context>

<pallas_src>
import math

import jax
import jax.numpy as jnp
from jax import lax
from jax.experimental import pallas as pl
from jax.experimental.pallas import tpu as pltpu

_INV_SQRT2 = 0.7071067811865476  # 1/sqrt(2) as a constant multiply (no division)


# ---------------------------------------------------------------------------
# Kernels
# ---------------------------------------------------------------------------
def _pwff_resident_kernel(x_ref, w1_ref, b1_ref, w2_ref, b2_ref, o_ref):
    """Weights fully VMEM-resident (constant index maps -> DMA'd once)."""
    x = x_ref[...]                                                     # [TM, H]
    h = jnp.dot(x, w1_ref[...], preferred_element_type=jnp.float32)   # [TM, 4H] f32
    h = h + b1_ref[...].astype(jnp.float32)
    h = h * 0.5 * (1.0 + lax.erf(h * _INV_SQRT2))                      # exact-erf GELU (f32)
    y = jnp.dot(h.astype(w2_ref.dtype), w2_ref[...],
                preferred_element_type=jnp.float32)                    # [TM, H] f32
    # TODO(synk): nn.Dropout is identity in eval mode (no RNG mask applied);
    # self.layerNorm exists in __init__ but is never used in forward, so omitted.
    y = y + b2_ref[...].astype(jnp.float32) + x.astype(jnp.float32)
    o_ref[...] = y.astype(o_ref.dtype)


def _pwff_chunked_kernel(x_ref, w1_ref, b1_ref, w2_ref, b2_ref, o_ref, acc_ref):
    """4H axis split over the innermost ("arbitrary") grid axis; f32 accumulator.

    NOTE: in this mode weight chunks are re-streamed once per M tile (grid_m x
    full weights of HBM traffic) -- tm must be large for arithmetic intensity.
    """
    c = pl.program_id(1)

    @pl.when(c == 0)
    def _init():
        acc_ref[...] = jnp.zeros_like(acc_ref)

    x = x_ref[...]                                                     # [TM, H]
    h = jnp.dot(x, w1_ref[...], preferred_element_type=jnp.float32)   # [TM, TC] f32
    h = h + b1_ref[...].astype(jnp.float32)
    h = h * 0.5 * (1.0 + lax.erf(h * _INV_SQRT2))
    acc_ref[...] += jnp.dot(h.astype(w2_ref.dtype), w2_ref[...],
                            preferred_element_type=jnp.float32)

    @pl.when(c == pl.num_programs(1) - 1)
    def _finalize():
        y = acc_ref[...] + b2_ref[...].astype(jnp.float32) + x.astype(jnp.float32)
        o_ref[...] = y.astype(o_ref.dtype)


# ---------------------------------------------------------------------------
# Tile / mode selection
# ---------------------------------------------------------------------------
def _tpu_vmem_capacity_bytes():
    try:
        cap = int(pltpu.get_tpu_info().vmem_capacity_bytes)
        if cap > 0:
            return cap
    except Exception:
        pass
    return 64 * 1024 * 1024  # conservative fallback (v7x per-TensorCore VMEM)


def _choose_tm(M, tm_cap):
    """Largest 8-aligned tile dividing M (prefer even grid count); pad only as last resort."""
    tm_cap = max(8, min(int(tm_cap), 1024, pl.cdiv(M, 8) * 8))
    tm_cap = (tm_cap // 8) * 8
    best = None        # largest divisor of M
    best_even = None   # largest divisor of M with an even grid count (megacore-friendly)
    t = tm_cap
    while t >= 8:
        if M % t == 0:
            if best is None:
                best = t
            if best_even is None and (M // t) % 2 == 0:
                best_even = t
            if best is not None and best_even is not None:
                break
        t -= 8
    if best_even is not None and 2 * best_even >= best:
        return best_even, False
    if best is not None:
        return best, False
    return tm_cap, True   # no exact divisor: pad M up to a multiple of tm_cap


def _choose_chunked_tiles(H, H4, x_isz, w_isz, budget, max_tc=None):
    """Pick (tc, row-capacity) for the chunked mode under the VMEM budget."""
    cands = [t for t in (1024, 768, 512, 384, 256, 128) if t <= H4 and H4 % t == 0]
    if not cands:
        cands = [H4]               # 4H not 128-aligned: single full chunk
    if max_tc is not None:
        filtered = [t for t in cands if t <= max_tc]
        if filtered:
            cands = filtered
    best = None                    # (row_cap, tc) fallback with the largest row budget
    for want_rows in (512, 256, 8):
        for tc in cands:           # largest tc first (fewer f32 accumulator RMW passes)
            fixed = 2 * (H * tc + tc * H + tc + H) * w_isz          # double-buffered weight chunks
            if fixed >= budget:
                continue
            per_row = 4 * H * x_isz + 4 * H + tc * (4 + w_isz)      # x/out (2x) + acc + GELU temps
            cap = (budget - fixed) // per_row
            if cap >= want_rows:
                return tc, int(cap)
            if best is None or cap > best[0]:
                best = (int(cap), tc)
    if best is None:
        return cands[-1], 8
    return best[1], max(8, best[0])


# ---------------------------------------------------------------------------
# Wrapper
# ---------------------------------------------------------------------------
def pointwise_feedforward(x, w1, b1, w2, b2, *, force_mode=None, max_tc=None):
    """x: [B, S, H]; w1: [H, 4H]; b1: [4H]; w2: [4H, H]; b2: [H]."""
    B, S, H = x.shape
    H4 = w1.shape[1]
    assert w1.shape == (H, H4) and w2.shape == (H4, H)
    assert b1.shape == (H4,) and b2.shape == (H,)

    M = B * S
    x2d = x.reshape(M, H)
    x_isz = jnp.dtype(x.dtype).itemsize
    w_isz = jnp.dtype(w1.dtype).itemsize

    vmem_cap = _tpu_vmem_capacity_bytes()
    budget = int(vmem_cap * 0.70)       # headroom for compiler-internal scratch
    vmem_limit = int(vmem_cap * 0.85)   # never hand the whole per-TC VMEM to the kernel

    # Weight-resident feasibility: 2x (conservative double-buffer) full weights + per-row cost.
    w_bytes = (H * H4 + H4 * H + H4 + H) * w_isz
    per_row_resident = 4 * H * x_isz + H4 * (4 + w_isz)    # x/out (2x) + f32 GELU + cast temps
    resident_cap = (budget - 2 * w_bytes) // per_row_resident if 2 * w_bytes < budget else 0

    if force_mode in ("resident", "chunked"):
        mode = force_mode
    else:
        mode = "resident" if resident_cap >= min(M, 128) else "chunked"

    if mode == "resident":
        tc = H4
        tm, padded = _choose_tm(M, max(8, resident_cap))
    else:
        tc, tm_cap = _choose_chunked_tiles(H, H4, x_isz, w_isz, budget, max_tc=max_tc)
        tm, padded = _choose_tm(M, tm_cap)

    Mp = pl.cdiv(M, tm) * tm
    if padded and Mp != M:
        # Last resort only (costs an extra HBM pass over the activations).
        x2d = jnp.pad(x2d, ((0, Mp - M), (0, 0)))
    grid_m = Mp // tm

    b1_2d = b1.reshape(1, H4)
    b2_2d = b2.reshape(1, H)

    weight_bytes = (H * H4 + H4 + H4 * H + H) * w_isz
    if mode == "chunked":
        weight_bytes *= grid_m          # weight chunks are re-streamed once per M tile
    cost = pl.CostEstimate(
        flops=4 * Mp * H * H4,          # two matmuls, 2*Mp*H*H4 each
        transcendentals=Mp * H4,        # erf
        bytes_accessed=2 * Mp * H * x_isz + weight_bytes,
    )

    if mode == "resident":
        grid_spec = pltpu.PrefetchScalarGridSpec(
            num_scalar_prefetch=0,
            grid=(grid_m,),
            in_specs=[
                pl.BlockSpec((tm, H), lambda i: (i, 0)),    # activations stream over i
                pl.BlockSpec((H, H4), lambda i: (0, 0)),    # W1 resident (DMA'd once)
                pl.BlockSpec((1, H4), lambda i: (0, 0)),    # b1 resident
                pl.BlockSpec((H4, H), lambda i: (0, 0)),    # W2 resident
                pl.BlockSpec((1, H), lambda i: (0, 0)),     # b2 resident
            ],
            out_specs=pl.BlockSpec((tm, H), lambda i: (i, 0)),
        )
        kernel = _pwff_resident_kernel
        semantics = ("parallel",)
    else:
        grid_spec = pltpu.PrefetchScalarGridSpec(
            num_scalar_prefetch=0,
            grid=(grid_m, H4 // tc),
            in_specs=[
                pl.BlockSpec((tm, H), lambda i, c: (i, 0)),    # x tile (resident over c)
                pl.BlockSpec((H, tc), lambda i, c: (0, c)),    # W1 column chunk
                pl.BlockSpec((1, tc), lambda i, c: (0, c)),    # b1 chunk
                pl.BlockSpec((tc, H), lambda i, c: (c, 0)),    # W2 row chunk
                pl.BlockSpec((1, H), lambda i, c: (0, 0)),     # b2
            ],
            out_specs=pl.BlockSpec((tm, H), lambda i, c: (i, 0)),
            scratch_shapes=[pltpu.VMEM((tm, H), jnp.float32)],  # f32 accumulator
        )
        kernel = _pwff_chunked_kernel
        semantics = ("parallel", "arbitrary")

    out2d = pl.pallas_call(
        kernel,
        out_shape=jax.ShapeDtypeStruct((Mp, H), x.dtype),
        grid_spec=grid_spec,
        compiler_params=pltpu.CompilerParams(
            dimension_semantics=semantics,
            vmem_limit_bytes=vmem_limit,
        ),
        cost_estimate=cost,
    )(x2d, w1, b1_2d, w2, b2_2d)

    if Mp != M:
        out2d = out2d[:M]
    return out2d.reshape(B, S, H)


# ---------------------------------------------------------------------------
# Reference + test harness
# ---------------------------------------------------------------------------
def _reference(x, w1, b1, w2, b2):
    xf = x.astype(jnp.float32)
    h = xf @ w1.astype(jnp.float32) + b1.astype(jnp.float32)
    h = h * 0.5 * (1.0 + lax.erf(h * _INV_SQRT2))
    y = h @ w2.astype(jnp.float32) + b2.astype(jnp.float32)
    return y + xf


def _make_params(key, H, dtype):
    k1, k2, k3, k4 = jax.random.split(key, 4)
    bound1 = 1.0 / math.sqrt(H)
    w1 = jax.random.uniform(k1, (H, 4 * H), jnp.float32, -bound1, bound1)
    b1 = jax.random.uniform(k2, (4 * H,), jnp.float32, -bound1, bound1)
    bound2 = 1.0 / math.sqrt(4 * H)
    w2 = jax.random.uniform(k3, (4 * H, H), jnp.float32, -bound2, bound2)
    b2 = jax.random.uniform(k4, (H,), jnp.float32, -bound2, bound2)
    return (w1.astype(dtype), b1.astype(dtype), w2.astype(dtype), b2.astype(dtype))


if __name__ == "__main__":
    key = jax.random.PRNGKey(0)

    # --- small f32 check (batch=2, seq=8, hidden=32, as implied by the module) ---
    B, S, H = 2, 8, 32
    kx, kp = jax.random.split(key)
    x = jax.random.normal(kx, (B, S, H), dtype=jnp.float32)
    w1, b1, w2, b2 = _make_params(kp, H, jnp.float32)

    out = jax.block_until_ready(pointwise_feedforward(x, w1, b1, w2, b2))
    ref = _reference(x, w1, b1, w2, b2)
    assert out.shape == (B, S, H)
    assert jnp.allclose(out, ref, atol=1e-5, rtol=1e-5), "f32 mismatch vs. reference"

    # --- bf16 operands (MXU-native dtype), f32 accumulation inside the kernel ---
    xb = x.astype(jnp.bfloat16)
    w1b, b1b, w2b, b2b = (t.astype(jnp.bfloat16) for t in (w1, b1, w2, b2))
    out_b = jax.block_until_ready(pointwise_feedforward(xb, w1b, b1b, w2b, b2b))
    ref_b = _reference(xb, w1b, b1b, w2b, b2b)
    assert out_b.dtype == jnp.bfloat16
    # NOTE: GELU output is cast to bf16 before the second matmul (reference keeps f32),
    # so a small quantization delta is expected and covered by the tolerance.
    assert jnp.allclose(out_b.astype(jnp.float32), ref_b, atol=5e-2, rtol=5e-2), \
        "bf16 mismatch vs. reference"

    # --- larger shape: exercises the M grid (weight-resident fast path) ---
    B2, S2, H2 = 4, 128, 128
    kx2, kp2 = jax.random.split(jax.random.PRNGKey(0), 2)
    x2 = jax.random.normal(kx2, (B2, S2, H2), dtype=jnp.float32)
    w1_2, b1_2, w2_2, b2_2 = _make_params(kp2, H2, jnp.float32)
    out2 = jax.block_until_ready(pointwise_feedforward(x2, w1_2, b1_2, w2_2, b2_2))
    ref2 = _reference(x2, w1_2, b1_2, w2_2, b2_2)
    assert out2.shape == (B2, S2, H2)
    assert jnp.allclose(out2, ref2, atol=1e-3, rtol=1e-3), "resident-path mismatch vs. reference"

    # --- same shape, forced chunked path (multi-step 4H accumulation) ---
    out3 = jax.block_until_ready(
        pointwise_feedforward(x2, w1_2, b1_2, w2_2, b2_2, force_mode="chunked", max_tc=128))
    assert jnp.allclose(out3, ref2, atol=1e-3, rtol=1e-3), "chunked-path mismatch vs. reference"

    print("KERNEL_OK")
</pallas_src>

<mosaic_0001>
module attributes {stable_mosaic.version = 11 : i64} {
  func.func @_pwff_resident_kernel(%arg0: i32, %arg1: memref<8x32xf32, #tpu.memory_space<vmem>>, %arg2: memref<32x128xf32, #tpu.memory_space<vmem>>, %arg3: memref<1x128xf32, #tpu.memory_space<vmem>>, %arg4: memref<128x32xf32, #tpu.memory_space<vmem>>, %arg5: memref<1x32xf32, #tpu.memory_space<vmem>>, %arg6: memref<8x32xf32, #tpu.memory_space<vmem>>) attributes {dimension_semantics = [#tpu.dimension_semantics<parallel>], iteration_bounds = array<i64: 2>, scalar_prefetch = 0 : i64, scratch_operands = 0 : i64, tpu.core_type = #tpu.core_type<tc>, window_params = [{transform_indices = @transform_0, window_bounds = array<i64: 8, 32>}, {pipeline_mode = #tpu.pipeline_mode<synchronous>, transform_indices = @transform_1, window_bounds = array<i64: 32, 128>}, {pipeline_mode = #tpu.pipeline_mode<synchronous>, transform_indices = @transform_2, window_bounds = array<i64: 1, 128>}, {pipeline_mode = #tpu.pipeline_mode<synchronous>, transform_indices = @transform_3, window_bounds = array<i64: 128, 32>}, {pipeline_mode = #tpu.pipeline_mode<synchronous>, transform_indices = @transform_4, window_bounds = array<i64: 1, 32>}, {transform_indices = @transform_5, window_bounds = array<i64: 8, 32>}]} {
    %c0 = arith.constant 0 : index
    %c0_0 = arith.constant 0 : index
    %0 = vector.load %arg1[%c0, %c0_0] : memref<8x32xf32, #tpu.memory_space<vmem>>, vector<8x32xf32>
    %c0_1 = arith.constant 0 : index
    %c0_2 = arith.constant 0 : index
    %1 = vector.load %arg2[%c0_1, %c0_2] : memref<32x128xf32, #tpu.memory_space<vmem>>, vector<32x128xf32>
    %cst = arith.constant dense<0.000000e+00> : vector<8x128xf32>
    %2 = tpu.matmul %0, %1, %cst {dimension_numbers = #tpu.dot_dimension_numbers<[1], [0], [0], [1], [0, 0, 1, 1], [], []>} : vector<8x32xf32>, vector<32x128xf32>, vector<8x128xf32> -> vector<8x128xf32>
    %c0_3 = arith.constant 0 : index
    %c0_4 = arith.constant 0 : index
    %3 = vector.load %arg3[%c0_3, %c0_4] : memref<1x128xf32, #tpu.memory_space<vmem>>, vector<1x128xf32>
    %4 = vector.broadcast %3 : vector<1x128xf32> to vector<8x128xf32>
    %5 = arith.addf %2, %4 : vector<8x128xf32>
    %cst_5 = arith.constant 5.000000e-01 : f32
    %6 = vector.broadcast %cst_5 : f32 to vector<8x128xf32>
    %7 = arith.mulf %5, %6 : vector<8x128xf32>
    %cst_6 = arith.constant 0.707106769 : f32
    %8 = vector.broadcast %cst_6 : f32 to vector<8x128xf32>
    %9 = arith.mulf %5, %8 : vector<8x128xf32>
    %10 = math.erf %9 : vector<8x128xf32>
    %cst_7 = arith.constant 1.000000e+00 : f32
    %11 = vector.broadcast %cst_7 : f32 to vector<8x128xf32>
    %12 = arith.addf %11, %10 : vector<8x128xf32>
    %13 = arith.mulf %7, %12 : vector<8x128xf32>
    %c0_8 = arith.constant 0 : index
    %c0_9 = arith.constant 0 : index
    %14 = vector.load %arg4[%c0_8, %c0_9] : memref<128x32xf32, #tpu.memory_space<vmem>>, vector<128x32xf32>
    %cst_10 = arith.constant dense<0.000000e+00> : vector<8x32xf32>
    %15 = tpu.matmul %13, %14, %cst_10 {dimension_numbers = #tpu.dot_dimension_numbers<[1], [0], [0], [1], [0, 0, 1, 1], [], []>} : vector<8x128xf32>, vector<128x32xf32>, vector<8x32xf32> -> vector<8x32xf32>
    %c0_11 = arith.constant 0 : index
    %c0_12 = arith.constant 0 : index
    %16 = vector.load %arg5[%c0_11, %c0_12] : memref<1x32xf32, #tpu.memory_space<vmem>>, vector<1x32xf32>
    %17 = vector.broadcast %16 : vector<1x32xf32> to vector<8x32xf32>
    %18 = arith.addf %15, %17 : vector<8x32xf32>
    %19 = arith.addf %18, %0 : vector<8x32xf32>
    %c0_13 = arith.constant 0 : index
    %c0_14 = arith.constant 0 : index
    %20 = vector.load %arg6[%c0_13, %c0_14] : memref<8x32xf32, #tpu.memory_space<vmem>>, vector<8x32xf32>
    tpu.vector_store %arg6[%c0_13, %c0_14], %19 {strides = array<i32>} : memref<8x32xf32, #tpu.memory_space<vmem>>, vector<8x32xf32>,
    return
  }
  func.func @transform_0(%arg0: i32) -> (i32, i32) {
    %c0_i32 = arith.constant 0 : i32
    %c0_i32_0 = arith.constant 0 : i32
    return %arg0, %c0_i32 : i32, i32
  }
  func.func @transform_1(%arg0: i32) -> (i32, i32) {
    %c0_i32 = arith.constant 0 : i32
    %c0_i32_0 = arith.constant 0 : i32
    %c0_i32_1 = arith.constant 0 : i32
    return %c0_i32, %c0_i32_0 : i32, i32
  }
  func.func @transform_2(%arg0: i32) -> (i32, i32) {
    %c0_i32 = arith.constant 0 : i32
    %c0_i32_0 = arith.constant 0 : i32
    %c0_i32_1 = arith.constant 0 : i32
    return %c0_i32, %c0_i32_0 : i32, i32
  }
  func.func @transform_3(%arg0: i32) -> (i32, i32) {
    %c0_i32 = arith.constant 0 : i32
    %c0_i32_0 = arith.constant 0 : i32
    %c0_i32_1 = arith.constant 0 : i32
    return %c0_i32, %c0_i32_0 : i32, i32
  }
  func.func @transform_4(%arg0: i32) -> (i32, i32) {
    %c0_i32 = arith.constant 0 : i32
    %c0_i32_0 = arith.constant 0 : i32
    %c0_i32_1 = arith.constant 0 : i32
    return %c0_i32, %c0_i32_0 : i32, i32
  }
  func.func @transform_5(%arg0: i32) -> (i32, i32) {
    %c0_i32 = arith.constant 0 : i32
    %c0_i32_0 = arith.constant 0 : i32
    return %arg0, %c0_i32 : i32, i32
  }
}

</mosaic_0001>

<bundles_post_ra>
// kernel: tpu_custom_call.1
= control target key start
LH: loop header
LB: loop body
LE: loop exit
PB: predicated region body
PF: predicated region fallthrough
CT: control target
= control target key end

     0   :  { %10 = vsyncpa [#allocation3], 0  ;;  %s900_s0 = inlined_call_operand.vmem [shape: f32[16,32], index: 0, kind: input, shape index: {}]   ;;  %s901_s1 = inlined_call_operand.vmem [shape: f32[32,128], index: 1, kind: input, shape index: {}]   ;;  %s902_s2 = inlined_call_operand.vmem [shape: f32[1,128], index: 2, kind: input, shape index: {}]   ;;  %s903_s3 = inlined_call_operand.vmem [shape: f32[128,32], index: 3, kind: input, shape index: {}]   ;;  %s904_s4 = inlined_call_operand.vmem [shape: f32[1,32], index: 4, kind: input, shape index: {}]   ;;  %s905_s5 = inlined_call_operand.hbm [shape: f32[16,32], index: 5, kind: output, shape index: {}]  }
   0x1   :  { %12 = vsyncpa [#allocation3 + $0x1], 0  ;;  %s732_s18 = smov 0   ;;  %s734_s19 = smov 0  }
   0x2   :  { %s736_s20 = smov 0   ;;  %s738_s21 = smov 0  }
   0x3 LB: > { %s753_s22 = sadd.s32 4294967295, %s696_s21   ;;  %s479_s23 = sadd.s32 4294967294, %s696_s21   ;;  %s696_s21 = sphi %s738_s21, %s911_s21   ;;  %s692_s20 = sphi %s736_s20, %s910_s20   ;;  %s688_s19 = sphi %s734_s19, %s909_s19   ;;  %s684_s18 = sphi %s732_s18, %s908_s18  }
   0x4   : > { %s757_s24 = sadd.s32 1, %s696_s21   ;;  %s135_s25 = sadd.s32 1, %s692_s20 }
   0x5   : > { %s132_s26 = ssub.s32 %s696_s21, %s757_s24  ;;  %p145_p0 = scmp.ne.s32.totalorder %s692_s20, %s688_s19 }
   0x6   : > { %p133_p1 = scmp.eq.s32.totalorder %s132_s26, 0  ;;  %p146_p2 = scmp.eq.s32.totalorder %s753_s22, 1 }
   0x7   : > { %p151_p3 = scmp.ne.s32.totalorder %s688_s19, %s684_s18  ;;  %p152_p4 = scmp.eq.s32.totalorder %s479_s23, 1 }
   0x8   : > { %s768_s27 = scalar_select %p133_p1, %s692_s20, %s135_s25  }
   0x9   : > { %p770_p5 = por %p146_p2, %p145_p0  ;;  %p774_p6 = por %p152_p4, %p151_p3 }
   0xa   : > { %p482_p7 = scmp.ge.s32.totalorder %s696_s21, 1  ;;  %p189_p8 = scmp.lt.s32.totalorder %s696_s21, 3 }
   0xc   : > { %p190_p9 = pnand %p482_p7, %p189_p8 }
   0xd   : > { %v221_v0 = vld [vmem:[%s901_s1] sm:$0xff] (!%p190_p9)  ;;  %v222_v1 = vld [vmem:[%s901_s1 + $0x8] sm:$0xff] (!%p190_p9)  ;;  %v223_v2 = vld [vmem:[%s901_s1 + $0x10] sm:$0xff] (!%p190_p9)  ;;  %v698_v3 = vmov (!%p190_p9), 0.0|0.0   ;;  %vm699_vm0 = vmmov (!%p190_p9), 0   ;;  %v700_v6 = vmov (!%p190_p9), 0.0  }
   0xe   : > { %193 = sbr.rel (%p190_p9) target bundleno = 487 (0x1e7), region = 40  ;;  %560 = vmatprep.subr.bf16.mxu0 (!%p190_p9), %v698_v3  ;;  %v561_v4 = vpack.c.bf16 (!%p190_p9), %v222_v1, %v221_v0  ;;  %v224_v5 = vld [vmem:[%s901_s1 + $0x18] sm:$0xff] (!%p190_p9)  ;;  %522 = vmatprep.mubr.msk.f32.mxu0 (!%p190_p9), %vm699_vm0, %v700_v6  ;;  %p216_p10 = scmp.lt.s32.totalorder (!%p190_p9), %s753_s22, 1  ;;  %v311_v7 = vld [vmem:[%s903_s3] sm:$0xff] (!%p190_p9)  ;;  %v312_v8 = vld [vmem:[%s903_s3 + $0x8] sm:$0xff] (!%p190_p9)  ;;  %vm232_vm1 = vcmask (!%p190_p9), 261120  }
   0xf   : > { %566 = vmatprep.subr.bf16.mxu1 (!%p190_p9), %v698_v3  ;;  %v567_v9 = vpack.c.bf16 (!%p190_p9), %v312_v8, %v311_v7  ;;  %v313_v10 = vld [vmem:[%s903_s3 + $0x10] sm:$0xff] (!%p190_p9)  ;;  %v314_v11 = vld [vmem:[%s903_s3 + $0x18] sm:$0xff] (!%p190_p9)  ;;  %557 = vmatprep.mubr.msk.f32.mxu1 (!%p190_p9), %vm699_vm0, %v700_v6  ;;  %v564_v12 = vpack.c.bf16 (!%p190_p9), %v224_v5, %v223_v2  ;;  %v315_v14 = vld [vmem:[%s903_s3 + $0x20] sm:$0xff] (!%p190_p9)  ;;  %s213_s26 = sand.u32 (!%p190_p9), 1, %s688_s19   ;;  %s489_s8 = sshll.u32 (!%p190_p9), %s753_s22, 7 }
  0x10   : > { %562 = vmatpush3.bf16.msra.mxu0 (!%p190_p9), %v561_v4  ;;  %v570_v13 = vpack.c.bf16 (!%p190_p9), %v314_v11, %v313_v10  ;;  %v316_v15 = vld [vmem:[%s903_s3 + $0x28] sm:$0xff] (!%p190_p9)  ;;  %v317_v18 = vld [vmem:[%s903_s3 + $0x30] sm:$0xff] (!%p190_p9)  ;;  %v318_v19 = vld [vmem:[%s903_s3 + $0x38] sm:$0xff] (!%p190_p9)  ;;  %s407_s14 = scalar_lea.sflag (!%p190_p9), [#allocation3], %s213_s26 }
  0x11   : > { %563 = vmatprep.subr.bf16.mxu0 (!%p190_p9), %v698_v3  ;;  %568 = vmatpush3.bf16.msra.mxu1 (!%p190_p9), %v567_v9  ;;  %v573_v17 = vpack.c.bf16 (!%p190_p9), %v316_v15, %v315_v14  ;;  %v576_v20 = vpack.c.bf16 (!%p190_p9), %v318_v19, %v317_v18  ;;  %v319_v21 = vld [vmem:[%s903_s3 + $0x40] sm:$0xff] (!%p190_p9)  ;;  %v320_v22 = vld [vmem:[%s903_s3 + $0x48] sm:$0xff] (!%p190_p9)  ;;  %v321_v24 = vld [vmem:[%s903_s3 + $0x50] sm:$0xff] (!%p190_p9) }
  0x12   : > { %569 = vmatprep.subr.bf16.mxu1 (!%p190_p9), %v698_v3  ;;  %v579_v23 = vpack.c.bf16 (!%p190_p9), %v320_v22, %v319_v21  ;;  %v322_v25 = vld [vmem:[%s903_s3 + $0x58] sm:$0xff] (!%p190_p9)  ;;  %v323_v27 = vld [vmem:[%s903_s3 + $0x60] sm:$0xff] (!%p190_p9)  ;;  %v324_v28 = vld [vmem:[%s903_s3 + $0x68] sm:$0xff] (!%p190_p9) }
  0x13   : > { %v582_v26 = vpack.c.bf16 (!%p190_p9), %v322_v25, %v321_v24  ;;  %v585_v29 = vpack.c.bf16 (!%p190_p9), %v324_v28, %v323_v27  ;;  %v325_v30 = vld [vmem:[%s903_s3 + $0x70] sm:$0xff] (!%p190_p9)  ;;  %v326_v31 = vld [vmem:[%s903_s3 + $0x78] sm:$0xff] (!%p190_p9)  ;;  %v485_v33 = vld [vmem:[%s902_s2] ss:$0 sm:$0xff] (!%p190_p9) }
  0x14   : > { %565 = vmatpush3.bf16.msra.mxu0 (!%p190_p9), %v564_v12  ;;  %v588_v32 = vpack.c.bf16 (!%p190_p9), %v326_v31, %v325_v30  ;;  %v487_v42 = vld [vmem:[%s904_s4] ss:$0 sm:$0xff] (!%p190_p9) }
  0x15   : > { %s217_s30 = scalar_select %p216_p10, %s753_s22, 1  ;;  %571 = vmatpush3.bf16.msra.mxu1 %v570_v13 }
  0x16   : > { %572 = vmatprep.subr.bf16.mxu1 %v698_v3  ;;  %s701_s22 = smov [#allocation2]  }
  0x17   : > { %s484_s6 = sshll.u32 %s217_s30, 3  ;;  %s483_s30 = sshll.u32 %s213_s26, 3 }
  0x18   : > { %s219_s13 = scalar_lea.vmem %s900_s0, %s484_s6  ;;  %s215_s9 = scalar_lea.vmem [#allocation2], %s483_s30 }
  0x19   : > { %v220_v16 = vld [vmem:[%s219_s13] sm:$0xff]  ;;  %574 = vmatpush3.bf16.msra.mxu1 %v573_v17  ;;  %s420_s10 = sshll.u32 %s215_s9, 4  ;;  %s857_s13 = scalar_lea.hbm %s905_s5, %s489_s8  ;;  %s859_s10 = int_to_ptr.vmem [resolvable:$true] %s420_s10 }
  0x1a   : > { %523 = vmatmul.mubr.msk.f32.vlgmr.msra.gmra.mrb[0].mxu0 %vm232_vm1, %v220_v16  ;;  %575 = vmatprep.subr.bf16.mxu1 %v698_v3  ;;  %s634_s15 = scalar_lea.vmem %s859_s10, 128  ;;  %s638_s16 = sshll.u32 %s701_s22, 4  ;;  %s639_s16 = int_to_ptr.vmem [resolvable:$false] %s638_s16 }
  0x1b   : > { %p635_p11 = scmp.ne.s32.totalorder %s859_s10, %s634_s15  ;;  %s640_s17 = scalar_lea.vmem %s639_s16, 256 }
  0x1c   : > { %p641_p0 = scmp.lt.s32.totalorder %s859_s10, %s639_s16  ;;  %p642_p1 = scmp.lt.s32.totalorder %s640_s17, %s634_s15 }
  0x1d   : > { %577 = vmatpush3.bf16.msra.mxu1 %v576_v20  ;;  %p636_p12 = pnand %p635_p11, %p770_p5 }
  0x1e   : > { %578 = vmatprep.subr.bf16.mxu1 %v698_v3  ;;  %p643_p2 = por %p642_p1, %p641_p0 }
  0x1f   : > { %p637_p13 = pneg %p636_p12 }
  0x21   : > { %580 = vmatpush3.bf16.msra.mxu1 %v579_v23  ;;  %p644_p3 = pnand %p643_p2, %p637_p13 }
  0x22   : > { %581 = vmatprep.subr.bf16.mxu1 %v698_v3 }
  0x25   : > { %583 = vmatpush3.bf16.msra.mxu1 %v582_v26 }
  0x26   : > { %584 = vmatprep.subr.bf16.mxu1 %v698_v3 }
  0x29   : > { %586 = vmatpush3.bf16.msra.mxu1 %v585_v29 }
  0x2a   : > { %587 = vmatprep.subr.bf16.mxu1 %v698_v3 }
  0x2d   : > { %589 = vmatpush3.bf16.msra.mxu1 %v588_v32 }
  0xed   : > { %v302_v34 = vpop.f32.mrb[0].mxu0 }
  0xee   : > { %v303_v35 = vadd.f32 %v485_v33, %v302_v34  ;;  %v524_v36 = vpop.f32.mrb[1].mxu0 }
  0xf0   : > { %v307_v37 = vmul.f32 0.70710677, %v303_v35  ;;  %v306_v39 = vmul.f32 0.5, %v303_v35 }
  0xf2   : > { %632 = verf.f32 %v307_v37 }
  0xfc   : > { %v633_v38 = vpop.eup %632 }
  0xfd   : > { %v309_v40 = vadd.f32 1.0, %v633_v38 }
  0xff   : > { %v310_v41 = vmul.f32 %v309_v40, %v306_v39 }
 0x101   : > { %558 = vmatmul.mubr.f32.vlgmr.msra.gmra.mrb[0].mxu1 %v310_v41 }
 0x1d4   : > { %v400_v43 = vpop.f32.mrb[0].mxu1 }
 0x1d5   : > { %v401_v44 = vadd.f32 %v487_v42, %v400_v43  ;;  %v559_v45 = vpop.f32.mrb[1].mxu1 }
 0x1d7   : > { %v404_v46 = vadd.f32 %v401_v44, %v220_v16 }
 0x1d9   : > { %405 = vst.msk [vmem:[%s215_s9] sm:$0xff] %vm232_vm1, %v404_v46 }
 0x1da   : > { %647 = shalt.err (!%p644_p3)
}
 0x1db   : > { %s648_s23 = scalar_lea.hbm %s857_s13, 128  ;;  %s652_s30 = scalar_lea.hbm %s905_s5, 256 }
 0x1dc   : > { %p649_p4 = scmp.ne.s32.totalorder %s857_s13, %s648_s23  ;;  %p653_p9 = scmp.lt.u32.totalorder %s857_s13, %s905_s5 }
 0x1dd   : > { %p654_p10 = scmp.lt.u32.totalorder %s652_s30, %s648_s23  ;;  %p656_p12 = scmp.lt.u32.totalorder %s648_s23, %s857_s13 }
 0x1de   : > { %p650_p7 = pnand %p649_p4, %p770_p5 }
 0x1df   : > { %p655_p11 = por %p654_p10, %p653_p9 }
 0x1e0   : > { %p651_p8 = pneg %p650_p7 }
 0x1e1   : > { %p657_p13 = por %p656_p12, %p655_p11 }
 0x1e3   : > { %p658_p0 = pnand %p657_p13, %p651_p8 }
 0x1e5   : > { %661 = shalt.err (!%p658_p0)
}
 0x1e6   : > { %590 = dma.vmem_to_hbm [thread:$0]  (%p770_p5), %s859_s10, 128, %s857_s13, %s407_s14  }
 0x1e7 PF: > { %p596_p1 = scmp.ge.s32.totalorder %s696_s21, 2  ;;  %s432_s8 = sand.u32 1, %s684_s18  }
 0x1e8   : > { %s433_s9 = scalar_lea.sflag [#allocation3], %s432_s8 }
 0x1e9   : > { %p593_p2 = pnand %p596_p1, %p774_p6 }
 0x1eb   : > { %679 = dma.done.wait (!%p593_p2), %s433_s9, 128  }
 0x1ec   : > { %681 = vsyncadd (!%p593_p2), %s433_s9, 4294967168  ;;  %p15_p3 = scmp.ge.s32.totalorder %s757_s24, 4   ;;  %s908_s18 = smov %s688_s19 }
 0x1ed   : > { %s909_s19 = smov %s692_s20  ;;  %s910_s20 = smov %s768_s27 }
 0x1ee   : > { %s911_s21 = smov %s757_s24  ;;  %17 = sbr.rel (!%p15_p3) target bundleno = 3 (0x3), region = 75 }
 0x1f5   :  { %438 = vsyncpa [#allocation3], 1 }
 0x1f6   :  { %440 = vsyncpa [#allocation3 + $0x1], 1 }

</bundles_post_ra>
